<compile_context>
chip_gen: v7x
topology: tpu7x:2x2x1
jax: 0.10.0
libtpu: 0.0.40
codegen_flags: <defaults>
</compile_context>

<pallas_src>
import jax
import jax.numpy as jnp
import numpy as np
from jax import lax
from jax.experimental import pallas as pl
from jax.experimental.pallas import tpu as pltpu

DEFAULT_1D_KERNEL_SIZE = 3
DEFAULT_1D_PADDING = 1
GN_EPS = 1e-5
L_TILE_CAP = 256            # rows of the (pre-upsample) length axis per grid step

_GELU_K0 = 0.7978845608028654   # sqrt(2/pi)
_GELU_K1 = 0.044715


def _gelu(x):
    # tanh-approximate GELU: tanh runs on the EUP slot; |err| <= ~3e-3 vs exact erf GELU.
    return 0.5 * x * (1.0 + jnp.tanh(_GELU_K0 * (x + _GELU_K1 * x * x * x)))


def _dot(a, b):
    # bf16 operands, f32 accumulation -> single MXU pass.
    return jnp.dot(a, b, preferred_element_type=jnp.float32)


def _shift_down(x, first_row, row_idx):
    # result[i] = x[i-1]; row 0 <- first_row (1, C).
    return jnp.where(row_idx == 0, first_row, pltpu.roll(x, 1, 0))


def _shift_up(x, last_row, row_idx):
    # result[i] = x[i+1]; row T-1 <- last_row (1, C).
    t = x.shape[0]
    return jnp.where(row_idx == t - 1, last_row, pltpu.roll(x, t - 1, 0))


def _conv_stats_kernel(x_ref, xe_ref, w_ref, bup_ref, v_ref, bc_ref, z_ref, st_ref):
    """Pass 1: ConvTranspose1d -> GELU -> Conv1d + residual, per (batch, L-tile).

    x_ref  : (1, T, Cin)     bf16  input rows of this tile
    xe_ref : (1, 1, 2, Cin)  bf16  halo rows [x[t-1], x[t+T]] (zero rows at sequence ends)
    w_ref  : (Cin, 3C)       bf16  ConvTranspose1d taps stacked along N: [W0|W1|W2]
    bup_ref: (1, C)          f32
    v_ref  : (C, 3C)         bf16  Conv1d taps stacked along N: [V0|V1|V2]
    bc_ref : (1, C)          f32
    z_ref  : (1, 2, T, C)    f32   un-normalized output, phase-major (even, odd)
    st_ref : (1, 1, 2, C)    f32   per-tile channel [sum, sum_of_squares]
    """
    T = x_ref.shape[1]
    C = bup_ref.shape[1]
    l = pl.program_id(1)
    is_first = l == 0
    is_last = l == pl.num_programs(1) - 1

    b_up = bup_ref[...]
    b_c = bc_ref[...]
    w = w_ref[...]
    v = v_ref[...]
    row = lax.broadcasted_iota(jnp.int32, (T, 1), 0)

    # ---- ConvTranspose1d (stride 2), phase decomposed; one MXU issue for all 3 taps ----
    u = _dot(x_ref[0], w)                       # (T, 3C) = [x.W0 | x.W1 | x.W2]
    eu = _dot(xe_ref[0, 0], w)                  # (2, 3C)  halo rows through the same taps
    u0, u1, u2 = u[:, 0:C], u[:, C:2 * C], u[:, 2 * C:3 * C]

    # u0_next[i] = x[i+1].W0 ; beyond the tile it comes from the halo row (zero at seq end)
    u0_next = _shift_up(u0, eu[1:2, 0:C], row)
    a_e = _gelu(u1 + b_up)                      # activation at even output positions 2i
    a_o = _gelu(u0_next + u2 + b_up)            # activation at odd output positions 2i+1

    # activations just outside the tile (Conv1d halo); zero at the sequence boundary,
    # matching the Conv1d zero padding of the length-2L sequence.
    a_o_prev = jnp.where(is_first, 0.0,
                         _gelu(u0[0:1] + eu[0:1, 2 * C:3 * C] + b_up))   # a_odd[t-1]
    a_e_next = jnp.where(is_last, 0.0,
                         _gelu(eu[1:2, C:2 * C] + b_up))                 # a_even[t+T]

    # ---- Conv1d (stride 1) on the interleaved sequence + residual ----
    p = _dot(a_e.astype(jnp.bfloat16), v)       # (T, 3C) = [a_e.V0 | a_e.V1 | a_e.V2]
    q = _dot(a_o.astype(jnp.bfloat16), v)
    epq = _dot(jnp.concatenate([a_o_prev, a_e_next], axis=0).astype(jnp.bfloat16), v)

    q0_prev = _shift_down(q[:, 0:C], epq[0:1, 0:C], row)                 # V0 . a_odd[i-1]
    p2_next = _shift_up(p[:, 2 * C:3 * C], epq[1:2, 2 * C:3 * C], row)   # V2 . a_even[i+1]

    z_e = q0_prev + p[:, C:2 * C] + q[:, 2 * C:3 * C] + b_c + a_e
    z_o = p[:, 0:C] + q[:, C:2 * C] + p2_next + b_c + a_o

    z_ref[0, 0] = z_e
    z_ref[0, 1] = z_o

    # ---- per-tile channel statistics for GroupNorm (kept in f32) ----
    ssum = jnp.sum(z_e, axis=0, keepdims=True) + jnp.sum(z_o, axis=0, keepdims=True)
    ssq = (jnp.sum(z_e * z_e, axis=0, keepdims=True)
           + jnp.sum(z_o * z_o, axis=0, keepdims=True))
    st_ref[0, 0] = jnp.concatenate([ssum, ssq], axis=0)


def _norm_act_kernel(z_ref, scale_ref, shift_ref, o_ref):
    """Pass 2: GroupNorm (affine pre-folded per channel) + GELU, elementwise per tile."""
    o_ref[0] = _gelu(z_ref[0] * scale_ref[0] + shift_ref[0])


def _pick_ltile(L, cap=L_TILE_CAP):
    if L <= cap:
        return L
    for t in range(cap, 7, -1):
        if t % 8 == 0 and L % t == 0:
            return t
    return L            # fallback: no tiling (still correct)


@jax.jit
def upsample_layer(x_ncl, params):
    """Forward pass. x_ncl: (B, Cin, L) float32 -> (B, Cout, 2L) float32."""
    wt, bt, wc, bc, gamma, beta = params
    B, Cin, L = x_ncl.shape
    Cout = wt.shape[1]
    assert Cout % 4 == 0, "GroupNorm(Cout // 4) needs Cout divisible by 4"
    T = _pick_ltile(L)
    nt = L // T

    # channels-last bf16 input (matmul operands; accumulation stays f32 in-kernel)
    x_nlc = jnp.transpose(x_ncl.astype(jnp.float32), (0, 2, 1)).astype(jnp.bfloat16)
    # halo rows for each L-tile: [x[t-1], x[t+T]], zero rows at the sequence boundary
    xp = jnp.pad(x_nlc, ((0, 0), (1, 1), (0, 0)))
    ids = jnp.arange(nt)
    x_edge = jnp.stack([xp[:, ids * T, :], xp[:, (ids + 1) * T + 1, :]], axis=2)  # (B,nt,2,Cin)

    # tap-stacked weights: columns [tap0 | tap1 | tap2]
    w_up = jnp.transpose(wt, (0, 2, 1)).reshape(Cin, 3 * Cout).astype(jnp.bfloat16)
    v_cv = jnp.transpose(wc, (1, 2, 0)).reshape(Cout, 3 * Cout).astype(jnp.bfloat16)
    b_up = bt.reshape(1, Cout).astype(jnp.float32)
    b_cv = bc.reshape(1, Cout).astype(jnp.float32)

    cost1 = pl.CostEstimate(
        flops=2 * B * L * 3 * Cout * (Cin + 2 * Cout),
        transcendentals=2 * B * L * Cout,
        bytes_accessed=(B * L * Cin * 2 + B * nt * 2 * Cin * 2
                        + (Cin + Cout) * 3 * Cout * 2 + 2 * Cout * 4
                        + B * 2 * L * Cout * 4 + B * nt * 2 * Cout * 4),
    )
    z, stats = pl.pallas_call(
        _conv_stats_kernel,
        out_shape=(jax.ShapeDtypeStruct((B, 2, L, Cout), jnp.float32),
                   jax.ShapeDtypeStruct((B, nt, 2, Cout), jnp.float32)),
        grid=(B, nt),
        in_specs=[
            pl.BlockSpec((1, T, Cin), lambda b, l: (b, l, 0)),
            pl.BlockSpec((1, 1, 2, Cin), lambda b, l: (b, l, 0, 0)),
            pl.BlockSpec((Cin, 3 * Cout), lambda b, l: (0, 0)),
            pl.BlockSpec((1, Cout), lambda b, l: (0, 0)),
            pl.BlockSpec((Cout, 3 * Cout), lambda b, l: (0, 0)),
            pl.BlockSpec((1, Cout), lambda b, l: (0, 0)),
        ],
        out_specs=(pl.BlockSpec((1, 2, T, Cout), lambda b, l: (b, 0, l, 0)),
                   pl.BlockSpec((1, 1, 2, Cout), lambda b, l: (b, l, 0, 0))),
        compiler_params=pltpu.CompilerParams(
            dimension_semantics=("parallel", "parallel"),
            vmem_limit_bytes=32 * 1024 * 1024),
        cost_estimate=cost1,
    )(x_nlc, x_edge, w_up, b_up, v_cv, b_cv)

    # ---- tiny XLA glue: fold GroupNorm stats into per-channel scale / shift ----
    ch = jnp.sum(stats, axis=1)                               # (B, 2, Cout)
    G = Cout // 4
    n = jnp.float32(4 * 2 * L)                                # elements per group
    mean_g = ch[:, 0].reshape(B, G, 4).sum(-1) / n
    var_g = ch[:, 1].reshape(B, G, 4).sum(-1) / n - mean_g * mean_g
    inv_g = lax.rsqrt(var_g + GN_EPS)
    mean_c = jnp.repeat(mean_g, 4, axis=1)                    # (B, Cout)
    inv_c = jnp.repeat(inv_g, 4, axis=1)
    scale = (inv_c * gamma[None, :])[:, None, :]              # (B, 1, Cout)
    shift = (beta[None, :] - mean_c * inv_c * gamma[None, :])[:, None, :]

    cost2 = pl.CostEstimate(
        flops=4 * B * L * Cout,
        transcendentals=2 * B * L * Cout,
        bytes_accessed=2 * B * 2 * L * Cout * 4 + 4 * B * Cout * 4,
    )
    y = pl.pallas_call(
        _norm_act_kernel,
        out_shape=jax.ShapeDtypeStruct((B, 2, L, Cout), jnp.float32),
        grid=(B, nt),
        in_specs=[
            pl.BlockSpec((1, 2, T, Cout), lambda b, l: (b, 0, l, 0)),
            pl.BlockSpec((1, 1, Cout), lambda b, l: (b, 0, 0)),
            pl.BlockSpec((1, 1, Cout), lambda b, l: (b, 0, 0)),
        ],
        out_specs=pl.BlockSpec((1, 2, T, Cout), lambda b, l: (b, 0, l, 0)),
        compiler_params=pltpu.CompilerParams(
            dimension_semantics=("parallel", "parallel"),
            vmem_limit_bytes=32 * 1024 * 1024),
        cost_estimate=cost2,
        input_output_aliases={0: 0},                          # normalize z in place
    )(z, scale, shift)

    # fold the even/odd interleave into the single NCL transpose the output layout needs
    return jnp.transpose(y, (0, 3, 2, 1)).reshape(B, Cout, 2 * L)


def reference(x_ncl, params):
    """Pure-JAX (XLA) reference with the module's exact semantics (f32, erf GELU)."""
    wt, bt, wc, bc, gamma, beta = params
    K = wt.shape[2]
    p = DEFAULT_1D_PADDING
    # ConvTranspose1d == conv of stride-dilated input with flipped/transposed kernel
    rhs_t = jnp.transpose(jnp.flip(wt, axis=2), (1, 0, 2))            # (Cout, Cin, K)
    y = lax.conv_general_dilated(
        x_ncl, rhs_t, window_strides=(1,),
        padding=[(K - 1 - p, K - 1 - p + 1)],                         # +1 = output_padding
        lhs_dilation=(2,), dimension_numbers=("NCH", "OIH", "NCH"),
        precision=lax.Precision.HIGHEST)
    y = y + bt[None, :, None]
    a = jax.nn.gelu(y, approximate=False)
    z = lax.conv_general_dilated(
        a, wc, window_strides=(1,), padding=[(p, p)],
        dimension_numbers=("NCH", "OIH", "NCH"),
        precision=lax.Precision.HIGHEST)
    z = z + bc[None, :, None] + a
    B, C, Lo = z.shape
    G = C // 4
    zg = z.reshape(B, G, C // G, Lo)
    mean = zg.mean(axis=(2, 3), keepdims=True)
    var = zg.var(axis=(2, 3), keepdims=True)
    zn = ((zg - mean) * lax.rsqrt(var + GN_EPS)).reshape(B, C, Lo)
    out = zn * gamma[None, :, None] + beta[None, :, None]
    return jax.nn.gelu(out, approximate=False)


if __name__ == "__main__":
    B, Cin, Cout, L = 2, 8, 8, 16        # Cout divisible by 4 (GroupNorm(Cout // 4, Cout))
    key = jax.random.PRNGKey(0)
    ks = jax.random.split(key, 7)
    wt = 0.2 * jax.random.normal(ks[0], (Cin, Cout, DEFAULT_1D_KERNEL_SIZE), jnp.float32)
    bt = 0.1 * jax.random.normal(ks[1], (Cout,), jnp.float32)
    wc = 0.2 * jax.random.normal(ks[2], (Cout, Cout, DEFAULT_1D_KERNEL_SIZE), jnp.float32)
    bc = 0.1 * jax.random.normal(ks[3], (Cout,), jnp.float32)
    gamma = 1.0 + 0.1 * jax.random.normal(ks[4], (Cout,), jnp.float32)
    beta = 0.1 * jax.random.normal(ks[5], (Cout,), jnp.float32)
    x = jax.random.normal(ks[6], (B, Cin, L), jnp.float32)
    params = (wt, bt, wc, bc, gamma, beta)

    out = jax.block_until_ready(upsample_layer(x, params))
    ref = jax.block_until_ready(reference(x, params))
    assert out.shape == (B, Cout, 2 * L), out.shape
    # bf16 MXU operands + tanh-GELU kernel vs exact f32 / erf-GELU reference: ~1e-2-scale error
    np.testing.assert_allclose(np.asarray(out), np.asarray(ref), rtol=3e-2, atol=3e-2)
    print("KERNEL_OK")
</pallas_src>

<mosaic_0001>
module attributes {stable_mosaic.version = 11 : i64} {
  func.func @_conv_stats_kernel(%arg0: i32, %arg1: i32, %arg2: memref<1x16x8xbf16, #tpu.memory_space<vmem>>, %arg3: memref<1x1x2x8xbf16, #tpu.memory_space<vmem>>, %arg4: memref<8x24xbf16, #tpu.memory_space<vmem>>, %arg5: memref<1x8xf32, #tpu.memory_space<vmem>>, %arg6: memref<8x24xbf16, #tpu.memory_space<vmem>>, %arg7: memref<1x8xf32, #tpu.memory_space<vmem>>, %arg8: memref<1x2x16x8xf32, #tpu.memory_space<vmem>>, %arg9: memref<1x1x2x8xf32, #tpu.memory_space<vmem>>) attributes {dimension_semantics = [#tpu.dimension_semantics<parallel>, #tpu.dimension_semantics<parallel>], iteration_bounds = array<i64: 2, 1>, scalar_prefetch = 0 : i64, scratch_operands = 0 : i64, tpu.core_type = #tpu.core_type<tc>, window_params = [{transform_indices = @transform_0, window_bounds = array<i64: 1, 16, 8>}, {transform_indices = @transform_1, window_bounds = array<i64: 1, 1, 2, 8>}, {pipeline_mode = #tpu.pipeline_mode<synchronous>, transform_indices = @transform_2, window_bounds = array<i64: 8, 24>}, {pipeline_mode = #tpu.pipeline_mode<synchronous>, transform_indices = @transform_3, window_bounds = array<i64: 1, 8>}, {pipeline_mode = #tpu.pipeline_mode<synchronous>, transform_indices = @transform_4, window_bounds = array<i64: 8, 24>}, {pipeline_mode = #tpu.pipeline_mode<synchronous>, transform_indices = @transform_5, window_bounds = array<i64: 1, 8>}, {transform_indices = @transform_6, window_bounds = array<i64: 1, 2, 16, 8>}, {transform_indices = @transform_7, window_bounds = array<i64: 1, 1, 2, 8>}]} {
    %c0_i32 = arith.constant 0 : i32
    %0 = arith.cmpi eq, %arg1, %c0_i32 : i32
    %c0_i32_0 = arith.constant 0 : i32
    %1 = arith.cmpi eq, %arg1, %c0_i32_0 : i32
    %c0 = arith.constant 0 : index
    %c0_1 = arith.constant 0 : index
    %2 = vector.load %arg5[%c0, %c0_1] : memref<1x8xf32, #tpu.memory_space<vmem>>, vector<1x8xf32>
    %c0_2 = arith.constant 0 : index
    %c0_3 = arith.constant 0 : index
    %3 = vector.load %arg7[%c0_2, %c0_3] : memref<1x8xf32, #tpu.memory_space<vmem>>, vector<1x8xf32>
    %c0_4 = arith.constant 0 : index
    %c0_5 = arith.constant 0 : index
    %4 = vector.load %arg4[%c0_4, %c0_5] : memref<8x24xbf16, #tpu.memory_space<vmem>>, vector<8x24xbf16>
    %c0_6 = arith.constant 0 : index
    %c0_7 = arith.constant 0 : index
    %5 = vector.load %arg6[%c0_6, %c0_7] : memref<8x24xbf16, #tpu.memory_space<vmem>>, vector<8x24xbf16>
    %6 = tpu.iota {dimensions = array<i32: 0>} : vector<16x1xi32>
    %c0_8 = arith.constant 0 : index
    %c0_9 = arith.constant 0 : index
    %c0_10 = arith.constant 0 : index
    %7 = vector.load %arg2[%c0_8, %c0_9, %c0_10] : memref<1x16x8xbf16, #tpu.memory_space<vmem>>, vector<1x16x8xbf16>
    %8 = vector.shape_cast %7 : vector<1x16x8xbf16> to vector<16x8xbf16>
    %cst = arith.constant dense<0.000000e+00> : vector<16x24xf32>
    %9 = tpu.matmul %8, %4, %cst {dimension_numbers = #tpu.dot_dimension_numbers<[1], [0], [0], [1], [0, 0, 1, 1], [], []>} : vector<16x8xbf16>, vector<8x24xbf16>, vector<16x24xf32> -> vector<16x24xf32>
    %c0_11 = arith.constant 0 : index
    %c0_12 = arith.constant 0 : index
    %c0_13 = arith.constant 0 : index
    %c0_14 = arith.constant 0 : index
    %10 = vector.load %arg3[%c0_11, %c0_12, %c0_13, %c0_14] : memref<1x1x2x8xbf16, #tpu.memory_space<vmem>>, vector<1x1x2x8xbf16>
    %11 = vector.shape_cast %10 : vector<1x1x2x8xbf16> to vector<2x8xbf16>
    %cst_15 = arith.constant dense<0.000000e+00> : vector<2x24xf32>
    %12 = tpu.matmul %11, %4, %cst_15 {dimension_numbers = #tpu.dot_dimension_numbers<[1], [0], [0], [1], [0, 0, 1, 1], [], []>} : vector<2x8xbf16>, vector<8x24xbf16>, vector<2x24xf32> -> vector<2x24xf32>
    %13 = vector.extract_strided_slice %9 {offsets = [0, 0], sizes = [16, 8], strides = [1, 1]} : vector<16x24xf32> to vector<16x8xf32>
    %14 = vector.extract_strided_slice %9 {offsets = [0, 8], sizes = [16, 8], strides = [1, 1]} : vector<16x24xf32> to vector<16x8xf32>
    %15 = vector.extract_strided_slice %9 {offsets = [0, 16], sizes = [16, 8], strides = [1, 1]} : vector<16x24xf32> to vector<16x8xf32>
    %16 = vector.extract_strided_slice %12 {offsets = [1, 0], sizes = [1, 8], strides = [1, 1]} : vector<2x24xf32> to vector<1x8xf32>
    %c15_i32 = arith.constant 15 : i32
    %17 = vector.broadcast %c15_i32 : i32 to vector<16x1xi32>
    %18 = arith.cmpi eq, %6, %17 : vector<16x1xi32>
    %c15_i32_16 = arith.constant 15 : i32
    %19 = tpu.dynamic_rotate %13 by %c15_i32_16 dim 0 : vector<16x8xf32>, i32 -> vector<16x8xf32>
    %20 = vector.shape_cast %18 : vector<16x1xi1> to vector<16x1xi1>
    %21 = vector.broadcast %20 : vector<16x1xi1> to vector<16x8xi1>
    %22 = vector.shape_cast %16 : vector<1x8xf32> to vector<1x8xf32>
    %23 = vector.broadcast %22 : vector<1x8xf32> to vector<16x8xf32>
    %24 = arith.select %21, %23, %19 : vector<16x8xi1>, vector<16x8xf32>
    %25 = vector.broadcast %2 : vector<1x8xf32> to vector<16x8xf32>
    %26 = arith.addf %14, %25 : vector<16x8xf32>
    %cst_17 = arith.constant 5.000000e-01 : f32
    %27 = vector.broadcast %cst_17 : f32 to vector<16x8xf32>
    %28 = arith.mulf %27, %26 : vector<16x8xf32>
    %cst_18 = arith.constant 4.471500e-02 : f32
    %29 = vector.broadcast %cst_18 : f32 to vector<16x8xf32>
    %30 = arith.mulf %29, %26 : vector<16x8xf32>
    %31 = arith.mulf %30, %26 : vector<16x8xf32>
    %32 = arith.mulf %31, %26 : vector<16x8xf32>
    %33 = arith.addf %26, %32 : vector<16x8xf32>
    %cst_19 = arith.constant 0.797884583 : f32
    %34 = vector.broadcast %cst_19 : f32 to vector<16x8xf32>
    %35 = arith.mulf %34, %33 : vector<16x8xf32>
    %36 = math.tanh %35 : vector<16x8xf32>
    %cst_20 = arith.constant 1.000000e+00 : f32
    %37 = vector.broadcast %cst_20 : f32 to vector<16x8xf32>
    %38 = arith.addf %37, %36 : vector<16x8xf32>
    %39 = arith.mulf %28, %38 : vector<16x8xf32>
    %40 = arith.addf %24, %15 : vector<16x8xf32>
    %41 = vector.broadcast %2 : vector<1x8xf32> to vector<16x8xf32>
    %42 = arith.addf %40, %41 : vector<16x8xf32>
    %cst_21 = arith.constant 5.000000e-01 : f32
    %43 = vector.broadcast %cst_21 : f32 to vector<16x8xf32>
    %44 = arith.mulf %43, %42 : vector<16x8xf32>
    %cst_22 = arith.constant 4.471500e-02 : f32
    %45 = vector.broadcast %cst_22 : f32 to vector<16x8xf32>
    %46 = arith.mulf %45, %42 : vector<16x8xf32>
    %47 = arith.mulf %46, %42 : vector<16x8xf32>
    %48 = arith.mulf %47, %42 : vector<16x8xf32>
    %49 = arith.addf %42, %48 : vector<16x8xf32>
    %cst_23 = arith.constant 0.797884583 : f32
    %50 = vector.broadcast %cst_23 : f32 to vector<16x8xf32>
    %51 = arith.mulf %50, %49 : vector<16x8xf32>
    %52 = math.tanh %51 : vector<16x8xf32>
    %cst_24 = arith.constant 1.000000e+00 : f32
    %53 = vector.broadcast %cst_24 : f32 to vector<16x8xf32>
    %54 = arith.addf %53, %52 : vector<16x8xf32>
    %55 = arith.mulf %44, %54 : vector<16x8xf32>
    %56 = vector.extract_strided_slice %13 {offsets = [0, 0], sizes = [1, 8], strides = [1, 1]} : vector<16x8xf32> to vector<1x8xf32>
    %57 = vector.extract_strided_slice %12 {offsets = [0, 16], sizes = [1, 8], strides = [1, 1]} : vector<2x24xf32> to vector<1x8xf32>
    %58 = arith.addf %56, %57 : vector<1x8xf32>
    %59 = arith.addf %58, %2 : vector<1x8xf32>
    %cst_25 = arith.constant 5.000000e-01 : f32
    %60 = vector.broadcast %cst_25 : f32 to vector<1x8xf32>
    %61 = arith.mulf %60, %59 : vector<1x8xf32>
    %cst_26 = arith.constant 4.471500e-02 : f32
    %62 = vector.broadcast %cst_26 : f32 to vector<1x8xf32>
    %63 = arith.mulf %62, %59 : vector<1x8xf32>
    %64 = arith.mulf %63, %59 : vector<1x8xf32>
    %65 = arith.mulf %64, %59 : vector<1x8xf32>
    %66 = arith.addf %59, %65 : vector<1x8xf32>
    %cst_27 = arith.constant 0.797884583 : f32
    %67 = vector.broadcast %cst_27 : f32 to vector<1x8xf32>
    %68 = arith.mulf %67, %66 : vector<1x8xf32>
    %69 = math.tanh %68 : vector<1x8xf32>
    %cst_28 = arith.constant 1.000000e+00 : f32
    %70 = vector.broadcast %cst_28 : f32 to vector<1x8xf32>
    %71 = arith.addf %70, %69 : vector<1x8xf32>
    %72 = arith.mulf %61, %71 : vector<1x8xf32>
    %cst_29 = arith.constant 0.000000e+00 : f32
    %73 = vector.broadcast %cst_29 : f32 to vector<1x8xf32>
    %74 = arith.select %0, %73, %72 : vector<1x8xf32>
    %75 = vector.extract_strided_slice %12 {offsets = [1, 8], sizes = [1, 8], strides = [1, 1]} : vector<2x24xf32> to vector<1x8xf32>
    %76 = arith.addf %75, %2 : vector<1x8xf32>
    %cst_30 = arith.constant 5.000000e-01 : f32
    %77 = vector.broadcast %cst_30 : f32 to vector<1x8xf32>
    %78 = arith.mulf %77, %76 : vector<1x8xf32>
    %cst_31 = arith.constant 4.471500e-02 : f32
    %79 = vector.broadcast %cst_31 : f32 to vector<1x8xf32>
    %80 = arith.mulf %79, %76 : vector<1x8xf32>
    %81 = arith.mulf %80, %76 : vector<1x8xf32>
    %82 = arith.mulf %81, %76 : vector<1x8xf32>
    %83 = arith.addf %76, %82 : vector<1x8xf32>
    %cst_32 = arith.constant 0.797884583 : f32
    %84 = vector.broadcast %cst_32 : f32 to vector<1x8xf32>
    %85 = arith.mulf %84, %83 : vector<1x8xf32>
    %86 = math.tanh %85 : vector<1x8xf32>
    %cst_33 = arith.constant 1.000000e+00 : f32
    %87 = vector.broadcast %cst_33 : f32 to vector<1x8xf32>
    %88 = arith.addf %87, %86 : vector<1x8xf32>
    %89 = arith.mulf %78, %88 : vector<1x8xf32>
    %cst_34 = arith.constant 0.000000e+00 : f32
    %90 = vector.broadcast %cst_34 : f32 to vector<1x8xf32>
    %91 = arith.select %1, %90, %89 : vector<1x8xf32>
    %92 = arith.truncf %39 : vector<16x8xf32> to vector<16x8xbf16>
    %cst_35 = arith.constant dense<0.000000e+00> : vector<16x24xf32>
    %93 = tpu.matmul %92, %5, %cst_35 {dimension_numbers = #tpu.dot_dimension_numbers<[1], [0], [0], [1], [0, 0, 1, 1], [], []>} : vector<16x8xbf16>, vector<8x24xbf16>, vector<16x24xf32> -> vector<16x24xf32>
    %94 = arith.truncf %55 : vector<16x8xf32> to vector<16x8xbf16>
    %cst_36 = arith.constant dense<0.000000e+00> : vector<16x24xf32>
    %95 = tpu.matmul %94, %5, %cst_36 {dimension_numbers = #tpu.dot_dimension_numbers<[1], [0], [0], [1], [0, 0, 1, 1], [], []>} : vector<16x8xbf16>, vector<8x24xbf16>, vector<16x24xf32> -> vector<16x24xf32>
    %96 = tpu.concatenate %74, %91 in 0 : vector<1x8xf32>, vector<1x8xf32> -> vector<2x8xf32>
    %97 = arith.truncf %96 : vector<2x8xf32> to vector<2x8xbf16>
    %cst_37 = arith.constant dense<0.000000e+00> : vector<2x24xf32>
    %98 = tpu.matmul %97, %5, %cst_37 {dimension_numbers = #tpu.dot_dimension_numbers<[1], [0], [0], [1], [0, 0, 1, 1], [], []>} : vector<2x8xbf16>, vector<8x24xbf16>, vector<2x24xf32> -> vector<2x24xf32>
    %99 = vector.extract_strided_slice %95 {offsets = [0, 0], sizes = [16, 8], strides = [1, 1]} : vector<16x24xf32> to vector<16x8xf32>
    %100 = vector.extract_strided_slice %98 {offsets = [0, 0], sizes = [1, 8], strides = [1, 1]} : vector<2x24xf32> to vector<1x8xf32>
    %c0_i32_38 = arith.constant 0 : i32
    %101 = vector.broadcast %c0_i32_38 : i32 to vector<16x1xi32>
    %102 = arith.cmpi eq, %6, %101 : vector<16x1xi32>
    %c1_i32 = arith.constant 1 : i32
    %103 = tpu.dynamic_rotate %99 by %c1_i32 dim 0 : vector<16x8xf32>, i32 -> vector<16x8xf32>
    %104 = vector.shape_cast %102 : vector<16x1xi1> to vector<16x1xi1>
    %105 = vector.broadcast %104 : vector<16x1xi1> to vector<16x8xi1>
    %106 = vector.shape_cast %100 : vector<1x8xf32> to vector<1x8xf32>
    %107 = vector.broadcast %106 : vector<1x8xf32> to vector<16x8xf32>
    %108 = arith.select %105, %107, %103 : vector<16x8xi1>, vector<16x8xf32>
    %109 = vector.extract_strided_slice %93 {offsets = [0, 16], sizes = [16, 8], strides = [1, 1]} : vector<16x24xf32> to vector<16x8xf32>
    %110 = vector.extract_strided_slice %98 {offsets = [1, 16], sizes = [1, 8], strides = [1, 1]} : vector<2x24xf32> to vector<1x8xf32>
    %c15_i32_39 = arith.constant 15 : i32
    %111 = vector.broadcast %c15_i32_39 : i32 to vector<16x1xi32>
    %112 = arith.cmpi eq, %6, %111 : vector<16x1xi32>
    %c15_i32_40 = arith.constant 15 : i32
    %113 = tpu.dynamic_rotate %109 by %c15_i32_40 dim 0 : vector<16x8xf32>, i32 -> vector<16x8xf32>
    %114 = vector.shape_cast %112 : vector<16x1xi1> to vector<16x1xi1>
    %115 = vector.broadcast %114 : vector<16x1xi1> to vector<16x8xi1>
    %116 = vector.shape_cast %110 : vector<1x8xf32> to vector<1x8xf32>
    %117 = vector.broadcast %116 : vector<1x8xf32> to vector<16x8xf32>
    %118 = arith.select %115, %117, %113 : vector<16x8xi1>, vector<16x8xf32>
    %119 = vector.extract_strided_slice %93 {offsets = [0, 8], sizes = [16, 8], strides = [1, 1]} : vector<16x24xf32> to vector<16x8xf32>
    %120 = arith.addf %108, %119 : vector<16x8xf32>
    %121 = vector.extract_strided_slice %95 {offsets = [0, 16], sizes = [16, 8], strides = [1, 1]} : vector<16x24xf32> to vector<16x8xf32>
    %122 = arith.addf %120, %121 : vector<16x8xf32>
    %123 = vector.broadcast %3 : vector<1x8xf32> to vector<16x8xf32>
    %124 = arith.addf %122, %123 : vector<16x8xf32>
    %125 = arith.addf %124, %39 : vector<16x8xf32>
    %126 = vector.extract_strided_slice %93 {offsets = [0, 0], sizes = [16, 8], strides = [1, 1]} : vector<16x24xf32> to vector<16x8xf32>
    %127 = vector.extract_strided_slice %95 {offsets = [0, 8], sizes = [16, 8], strides = [1, 1]} : vector<16x24xf32> to vector<16x8xf32>
    %128 = arith.addf %126, %127 : vector<16x8xf32>
    %129 = arith.addf %128, %118 : vector<16x8xf32>
    %130 = vector.broadcast %3 : vector<1x8xf32> to vector<16x8xf32>
    %131 = arith.addf %129, %130 : vector<16x8xf32>
    %132 = arith.addf %131, %55 : vector<16x8xf32>
    %c0_41 = arith.constant 0 : index
    %c0_42 = arith.constant 0 : index
    %c0_43 = arith.constant 0 : index
    %c0_44 = arith.constant 0 : index
    %133 = vector.load %arg8[%c0_41, %c0_42, %c0_43, %c0_44] : memref<1x2x16x8xf32, #tpu.memory_space<vmem>>, vector<1x1x16x8xf32>
    %134 = vector.shape_cast %133 : vector<1x1x16x8xf32> to vector<16x8xf32>
    %135 = vector.shape_cast %125 : vector<16x8xf32> to vector<1x1x16x8xf32>
    tpu.vector_store %arg8[%c0_41, %c0_42, %c0_43, %c0_44], %135 {strides = array<i32>} : memref<1x2x16x8xf32, #tpu.memory_space<vmem>>, vector<1x1x16x8xf32>,
    %c0_45 = arith.constant 0 : index
    %c1 = arith.constant 1 : index
    %c0_46 = arith.constant 0 : index
    %c0_47 = arith.constant 0 : index
    %136 = vector.load %arg8[%c0_45, %c1, %c0_46, %c0_47] : memref<1x2x16x8xf32, #tpu.memory_space<vmem>>, vector<1x1x16x8xf32>
    %137 = vector.shape_cast %136 : vector<1x1x16x8xf32> to vector<16x8xf32>
    %138 = vector.shape_cast %132 : vector<16x8xf32> to vector<1x1x16x8xf32>
    tpu.vector_store %arg8[%c0_45, %c1, %c0_46, %c0_47], %138 {strides = array<i32>} : memref<1x2x16x8xf32, #tpu.memory_space<vmem>>, vector<1x1x16x8xf32>,
    %cst_48 = arith.constant dense<0.000000e+00> : vector<8xf32>
    %139 = vector.multi_reduction <add>, %125, %cst_48 [0] : vector<16x8xf32> to vector<8xf32>
    %140 = vector.shape_cast %139 : vector<8xf32> to vector<1x8xf32>
    %cst_49 = arith.constant dense<0.000000e+00> : vector<8xf32>
    %141 = vector.multi_reduction <add>, %132, %cst_49 [0] : vector<16x8xf32> to vector<8xf32>
    %142 = vector.shape_cast %141 : vector<8xf32> to vector<1x8xf32>
    %143 = arith.addf %140, %142 : vector<1x8xf32>
    %144 = arith.mulf %125, %125 : vector<16x8xf32>
    %cst_50 = arith.constant dense<0.000000e+00> : vector<8xf32>
    %145 = vector.multi_reduction <add>, %144, %cst_50 [0] : vector<16x8xf32> to vector<8xf32>
    %146 = vector.shape_cast %145 : vector<8xf32> to vector<1x8xf32>
    %147 = arith.mulf %132, %132 : vector<16x8xf32>
    %cst_51 = arith.constant dense<0.000000e+00> : vector<8xf32>
    %148 = vector.multi_reduction <add>, %147, %cst_51 [0] : vector<16x8xf32> to vector<8xf32>
    %149 = vector.shape_cast %148 : vector<8xf32> to vector<1x8xf32>
    %150 = arith.addf %146, %149 : vector<1x8xf32>
    %151 = tpu.concatenate %143, %150 in 0 : vector<1x8xf32>, vector<1x8xf32> -> vector<2x8xf32>
    %c0_52 = arith.constant 0 : index
    %c0_53 = arith.constant 0 : index
    %c0_54 = arith.constant 0 : index
    %c0_55 = arith.constant 0 : index
    %152 = vector.load %arg9[%c0_52, %c0_53, %c0_54, %c0_55] : memref<1x1x2x8xf32, #tpu.memory_space<vmem>>, vector<1x1x2x8xf32>
    %153 = vector.shape_cast %152 : vector<1x1x2x8xf32> to vector<2x8xf32>
    %154 = vector.shape_cast %151 : vector<2x8xf32> to vector<1x1x2x8xf32>
    tpu.vector_store %arg9[%c0_52, %c0_53, %c0_54, %c0_55], %154 {strides = array<i32>} : memref<1x1x2x8xf32, #tpu.memory_space<vmem>>, vector<1x1x2x8xf32>,
    return
  }
  func.func @transform_0(%arg0: i32, %arg1: i32) -> (i32, i32, i32) {
    %c0_i32 = arith.constant 0 : i32
    %c0_i32_0 = arith.constant 0 : i32
    return %arg0, %arg1, %c0_i32 : i32, i32, i32
  }
  func.func @transform_1(%arg0: i32, %arg1: i32) -> (i32, i32, i32, i32) {
    %c0_i32 = arith.constant 0 : i32
    %c0_i32_0 = arith.constant 0 : i32
    %c0_i32_1 = arith.constant 0 : i32
    return %arg0, %arg1, %c0_i32, %c0_i32_0 : i32, i32, i32, i32
  }
  func.func @transform_2(%arg0: i32, %arg1: i32) -> (i32, i32) {
    %c0_i32 = arith.constant 0 : i32
    %c0_i32_0 = arith.constant 0 : i32
    %c0_i32_1 = arith.constant 0 : i32
    return %c0_i32, %c0_i32_0 : i32, i32
  }
  func.func @transform_3(%arg0: i32, %arg1: i32) -> (i32, i32) {
    %c0_i32 = arith.constant 0 : i32
    %c0_i32_0 = arith.constant 0 : i32
    %c0_i32_1 = arith.constant 0 : i32
    return %c0_i32, %c0_i32_0 : i32, i32
  }
  func.func @transform_4(%arg0: i32, %arg1: i32) -> (i32, i32) {
    %c0_i32 = arith.constant 0 : i32
    %c0_i32_0 = arith.constant 0 : i32
    %c0_i32_1 = arith.constant 0 : i32
    return %c0_i32, %c0_i32_0 : i32, i32
  }
  func.func @transform_5(%arg0: i32, %arg1: i32) -> (i32, i32) {
    %c0_i32 = arith.constant 0 : i32
    %c0_i32_0 = arith.constant 0 : i32
    %c0_i32_1 = arith.constant 0 : i32
    return %c0_i32, %c0_i32_0 : i32, i32
  }
  func.func @transform_6(%arg0: i32, %arg1: i32) -> (i32, i32, i32, i32) {
    %c0_i32 = arith.constant 0 : i32
    %c0_i32_0 = arith.constant 0 : i32
    %c0_i32_1 = arith.constant 0 : i32
    return %arg0, %c0_i32, %arg1, %c0_i32_0 : i32, i32, i32, i32
  }
  func.func @transform_7(%arg0: i32, %arg1: i32) -> (i32, i32, i32, i32) {
    %c0_i32 = arith.constant 0 : i32
    %c0_i32_0 = arith.constant 0 : i32
    %c0_i32_1 = arith.constant 0 : i32
    return %arg0, %arg1, %c0_i32, %c0_i32_0 : i32, i32, i32, i32
  }
}

module attributes {stable_mosaic.version = 11 : i64} {
  func.func @_norm_act_kernel(%arg0: i32, %arg1: i32, %arg2: memref<1x2x16x8xf32, #tpu.memory_space<vmem>>, %arg3: memref<1x1x8xf32, #tpu.memory_space<vmem>>, %arg4: memref<1x1x8xf32, #tpu.memory_space<vmem>>, %arg5: memref<1x2x16x8xf32, #tpu.memory_space<vmem>>) attributes {dimension_semantics = [#tpu.dimension_semantics<parallel>, #tpu.dimension_semantics<parallel>], iteration_bounds = array<i64: 2, 1>, scalar_prefetch = 0 : i64, scratch_operands = 0 : i64, tpu.core_type = #tpu.core_type<tc>, window_params = [{transform_indices = @transform_0, window_bounds = array<i64: 1, 2, 16, 8>}, {transform_indices = @transform_1, window_bounds = array<i64: 1, 1, 8>}, {transform_indices = @transform_2, window_bounds = array<i64: 1, 1, 8>}, {transform_indices = @transform_3, window_bounds = array<i64: 1, 2, 16, 8>}]} {
    %c0 = arith.constant 0 : index
    %c0_0 = arith.constant 0 : index
    %c0_1 = arith.constant 0 : index
    %c0_2 = arith.constant 0 : index
    %0 = vector.load %arg2[%c0, %c0_0, %c0_1, %c0_2] : memref<1x2x16x8xf32, #tpu.memory_space<vmem>>, vector<1x2x16x8xf32>
    %1 = vector.shape_cast %0 : vector<1x2x16x8xf32> to vector<2x16x8xf32>
    %c0_3 = arith.constant 0 : index
    %c0_4 = arith.constant 0 : index
    %c0_5 = arith.constant 0 : index
    %2 = vector.load %arg3[%c0_3, %c0_4, %c0_5] : memref<1x1x8xf32, #tpu.memory_space<vmem>>, vector<1x1x8xf32>
    %3 = vector.shape_cast %2 : vector<1x1x8xf32> to vector<1x8xf32>
    %4 = vector.shape_cast %3 : vector<1x8xf32> to vector<1x1x8xf32>
    %5 = vector.broadcast %4 : vector<1x1x8xf32> to vector<2x16x8xf32>
    %6 = arith.mulf %1, %5 : vector<2x16x8xf32>
    %c0_6 = arith.constant 0 : index
    %c0_7 = arith.constant 0 : index
    %c0_8 = arith.constant 0 : index
    %7 = vector.load %arg4[%c0_6, %c0_7, %c0_8] : memref<1x1x8xf32, #tpu.memory_space<vmem>>, vector<1x1x8xf32>
    %8 = vector.shape_cast %7 : vector<1x1x8xf32> to vector<1x8xf32>
    %9 = vector.shape_cast %8 : vector<1x8xf32> to vector<1x1x8xf32>
    %10 = vector.broadcast %9 : vector<1x1x8xf32> to vector<2x16x8xf32>
    %11 = arith.addf %6, %10 : vector<2x16x8xf32>
    %cst = arith.constant 5.000000e-01 : f32
    %12 = vector.broadcast %cst : f32 to vector<2x16x8xf32>
    %13 = arith.mulf %12, %11 : vector<2x16x8xf32>
    %cst_9 = arith.constant 4.471500e-02 : f32
    %14 = vector.broadcast %cst_9 : f32 to vector<2x16x8xf32>
    %15 = arith.mulf %14, %11 : vector<2x16x8xf32>
    %16 = arith.mulf %15, %11 : vector<2x16x8xf32>
    %17 = arith.mulf %16, %11 : vector<2x16x8xf32>
    %18 = arith.addf %11, %17 : vector<2x16x8xf32>
    %cst_10 = arith.constant 0.797884583 : f32
    %19 = vector.broadcast %cst_10 : f32 to vector<2x16x8xf32>
    %20 = arith.mulf %19, %18 : vector<2x16x8xf32>
    %21 = math.tanh %20 : vector<2x16x8xf32>
    %cst_11 = arith.constant 1.000000e+00 : f32
    %22 = vector.broadcast %cst_11 : f32 to vector<2x16x8xf32>
    %23 = arith.addf %22, %21 : vector<2x16x8xf32>
    %24 = arith.mulf %13, %23 : vector<2x16x8xf32>
    %c0_12 = arith.constant 0 : index
    %c0_13 = arith.constant 0 : index
    %c0_14 = arith.constant 0 : index
    %c0_15 = arith.constant 0 : index
    %25 = vector.load %arg5[%c0_12, %c0_13, %c0_14, %c0_15] : memref<1x2x16x8xf32, #tpu.memory_space<vmem>>, vector<1x2x16x8xf32>
    %26 = vector.shape_cast %25 : vector<1x2x16x8xf32> to vector<2x16x8xf32>
    %27 = vector.shape_cast %24 : vector<2x16x8xf32> to vector<1x2x16x8xf32>
    tpu.vector_store %arg5[%c0_12, %c0_13, %c0_14, %c0_15], %27 {strides = array<i32>} : memref<1x2x16x8xf32, #tpu.memory_space<vmem>>, vector<1x2x16x8xf32>,
    return
  }
  func.func @transform_0(%arg0: i32, %arg1: i32) -> (i32, i32, i32, i32) {
    %c0_i32 = arith.constant 0 : i32
    %c0_i32_0 = arith.constant 0 : i32
    %c0_i32_1 = arith.constant 0 : i32
    return %arg0, %c0_i32, %arg1, %c0_i32_0 : i32, i32, i32, i32
  }
  func.func @transform_1(%arg0: i32, %arg1: i32) -> (i32, i32, i32) {
    %c0_i32 = arith.constant 0 : i32
    %c0_i32_0 = arith.constant 0 : i32
    %c0_i32_1 = arith.constant 0 : i32
    return %arg0, %c0_i32, %c0_i32_0 : i32, i32, i32
  }
  func.func @transform_2(%arg0: i32, %arg1: i32) -> (i32, i32, i32) {
    %c0_i32 = arith.constant 0 : i32
    %c0_i32_0 = arith.constant 0 : i32
    %c0_i32_1 = arith.constant 0 : i32
    return %arg0, %c0_i32, %c0_i32_0 : i32, i32, i32
  }
  func.func @transform_3(%arg0: i32, %arg1: i32) -> (i32, i32, i32, i32) {
    %c0_i32 = arith.constant 0 : i32
    %c0_i32_0 = arith.constant 0 : i32
    %c0_i32_1 = arith.constant 0 : i32
    return %arg0, %c0_i32, %arg1, %c0_i32_0 : i32, i32, i32, i32
  }
}

</mosaic_0001>

<bundles_post_ra>
// kernel: squeeze.2
= control target key start
LH: loop header
LB: loop body
LE: loop exit
PB: predicated region body
PF: predicated region fallthrough
CT: control target
= control target key end

     0   :  { %vm7_vm0 = vcmask 31744   ;;  %s48_s0 = inlined_call_operand.vmem [shape: f32[2,8], index: 0, kind: input, shape index: {}]   ;;  %s49_s1 = inlined_call_operand.vmem [shape: f32[2,2,4], index: 1, kind: output, shape index: {}]  }
   0x1   :  { %v4_v0 = vld [vmem:[%s48_s0] sm:$0x3]  ;;  %s28_s0 = smov 124  }
   0x2   :  { %5 = vst [vmem:[#allocation1] sm:$0x3] %v4_v0 }
   0x9   :  { %v9_v1 = vld [vmem:[#allocation1] sm:$0x3]  }
   0xa   :  { %v6_v2 = vld [vmem:[#allocation1] sm:$0x3]   ;;  %10 = vrot.lane.b32.xlu0 %v9_v1, %s28_s0 }
   0xb   :  { %8 = vst.msk [vmem:[#allocation0] ss:$8 sm:$0x3] %vm7_vm0, %v6_v2  }
  0x7c   :  { %v11_v3 = vpop.permute.xlu0 %10  }
  0x7d   :  { %14 = vst.msk [vmem:[#allocation0 + $0x1] ss:$8 sm:$0x3] %vm7_vm0, %v11_v3  }
  0x84   :  { %v18_v4 = vld [vmem:[#allocation0] sm:$0x3]  ;;  %v22_v5 = vld [vmem:[#allocation0 + $0x8] sm:$0x3] }
  0x85   :  { %20 = vst [vmem:[%s49_s1] sm:$0x3] %v18_v4  ;;  %26 = vst [vmem:[%s49_s1 + $0x2] sm:$0x3] %v22_v5 }

// kernel: upsample_layer.3
= control target key start
LH: loop header
LB: loop body
LE: loop exit
PB: predicated region body
PF: predicated region fallthrough
CT: control target
= control target key end

     0   :  { %s501_s12 = smov 0   ;;  %s503_s13 = smov 0   ;;  %s549_s0 = inlined_call_operand.vmem [shape: f32[2,2,16,8], index: 0, kind: input, shape index: {}, may-alias: {0,3}]   ;;  %s550_s1 = inlined_call_operand.vmem [shape: f32[2,1,8], index: 1, kind: input, shape index: {}]   ;;  %s551_s2 = inlined_call_operand.vmem [shape: f32[2,1,8], index: 2, kind: input, shape index: {}]   ;;  %s552_s3 = inlined_call_operand.vmem [shape: f32[2,2,16,8], index: 3, kind: output, shape index: {}, may-alias: {0,3}]  }
   0x1   :  { %s505_s14 = smov 0  }
   0x2 LB: > { %s25_s15 = sadd.s32 1, %s475_s13  ;;  %p414_p0 = scmp.ge.s32.totalorder %s479_s14, 1  ;;  %s479_s14 = sphi %s505_s14, %s13_s14   ;;  %s475_s13 = sphi %s503_s13, %s554_s13   ;;  %s471_s12 = sphi %s501_s12, %s553_s12  }
   0x3   : > { %p27_p1 = scmp.ge.s32.totalorder %s25_s15, 2  ;;  %p174_p2 = scmp.lt.s32.totalorder %s479_s14, 3 }
   0x5   : > { %s556_s15 = smov (%p27_p1, %s25_s15), 0  ;;  %p175_p3 = pnand %p414_p0, %p174_p2 }
   0x6   : > { %p213_p4 = scmp.lt.s32.totalorder (!%p175_p3), %s471_s12, 1  ;;  %vm300_vm0 = vcmask (!%p175_p3), 64512  }
   0x7   : > { %178 = sbr.rel (%p175_p3) target bundleno = 51 (0x33), region = 32 }
   0xe   : > { %s558_s12 = smov (!%p213_p4, %s471_s12), 1 }
   0xf   : > { %s423_s16 = sshll.u32 %s558_s12, 5  ;;  %s224_s19 = scalar_lea.vmem %s550_s1, %s558_s12 }
  0x10   : > { %s220_s22 = scalar_lea.vmem %s549_s0, %s423_s16  ;;  %s227_s25 = scalar_lea.vmem %s551_s2, %s558_s12  ;;  %v419_v0 = vld [vmem:[%s224_s19] ss:$0 sm:$0xff] }
  0x11   : > { %v238_v1 = vld [vmem:[%s220_s22] sm:$0xff]  ;;  %v239_v2 = vld [vmem:[%s220_s22 + $0x8] sm:$0xff]  ;;  %v240_v3 = vld [vmem:[%s220_s22 + $0x10] sm:$0xff]  ;;  %s236_s28 = scalar_lea.vmem %s552_s3, %s423_s16 }
  0x12   : > { %v241_v4 = vld [vmem:[%s220_s22 + $0x18] sm:$0xff]  ;;  %v249_v5 = vmul.f32 %v419_v0, %v238_v1  ;;  %v250_v6 = vmul.f32 %v419_v0, %v239_v2  ;;  %v251_v7 = vmul.f32 %v419_v0, %v240_v3  ;;  %v420_v8 = vld [vmem:[%s227_s25] ss:$0 sm:$0xff] }
  0x13   : > { %v252_v9 = vmul.f32 %v419_v0, %v241_v4 }
  0x14   : > { %v260_v10 = vadd.f32 %v420_v8, %v249_v5  ;;  %v261_v11 = vadd.f32 %v420_v8, %v250_v6  ;;  %v262_v12 = vadd.f32 %v420_v8, %v251_v7 }
  0x15   : > { %v263_v13 = vadd.f32 %v420_v8, %v252_v9 }
  0x16   : > { %v268_v14 = vmul.f32 0.044715, %v260_v10  ;;  %v269_v15 = vmul.f32 0.044715, %v261_v11  ;;  %v270_v16 = vmul.f32 0.044715, %v262_v12 }
  0x17   : > { %v271_v17 = vmul.f32 0.044715, %v263_v13  ;;  %v264_v34 = vmul.f32 0.5, %v260_v10  ;;  %v265_v36 = vmul.f32 0.5, %v261_v11  ;;  %v266_v39 = vmul.f32 0.5, %v262_v12 }
  0x18   : > { %v272_v18 = vmul.f32 %v268_v14, %v260_v10  ;;  %v273_v19 = vmul.f32 %v269_v15, %v261_v11  ;;  %v274_v20 = vmul.f32 %v270_v16, %v262_v12  ;;  %v267_v42 = vmul.f32 0.5, %v263_v13 }
  0x19   : > { %v275_v21 = vmul.f32 %v271_v17, %v263_v13 }
  0x1a   : > { %v276_v22 = vmul.f32 %v272_v18, %v260_v10  ;;  %v277_v23 = vmul.f32 %v273_v19, %v261_v11  ;;  %v278_v24 = vmul.f32 %v274_v20, %v262_v12 }
  0x1b   : > { %v279_v25 = vmul.f32 %v275_v21, %v263_v13 }
  0x1c   : > { %v280_v26 = vadd.f32 %v276_v22, %v260_v10  ;;  %v281_v27 = vadd.f32 %v277_v23, %v261_v11  ;;  %v282_v28 = vadd.f32 %v278_v24, %v262_v12 }
  0x1d   : > { %v283_v29 = vadd.f32 %v279_v25, %v263_v13 }
  0x1e   : > { %v284_v30 = vmul.f32 0.7978846, %v280_v26  ;;  %v285_v31 = vmul.f32 0.7978846, %v281_v27  ;;  %v286_v32 = vmul.f32 0.7978846, %v282_v28 }
  0x1f   : > { %v287_v33 = vmul.f32 0.7978846, %v283_v29 }
  0x20   : > { %449 = vtanh.f32 %v284_v30 }
  0x21   : > { %451 = vtanh.f32 %v285_v31 }
  0x22   : > { %453 = vtanh.f32 %v286_v32 }
  0x23   : > { %455 = vtanh.f32 %v287_v33 }
  0x2a   : > { %v450_v35 = vpop.eup %449 }
  0x2b   : > { %v452_v37 = vpop.eup %451  ;;  %v292_v38 = vadd.f32 1.0, %v450_v35 }
  0x2c   : > { %v454_v40 = vpop.eup %453  ;;  %v293_v41 = vadd.f32 1.0, %v452_v37 }
  0x2d   : > { %v456_v43 = vpop.eup %455  ;;  %v296_v44 = vmul.f32 %v292_v38, %v264_v34  ;;  %v294_v45 = vadd.f32 1.0, %v454_v40 }
  0x2e   : > { %v297_v46 = vmul.f32 %v293_v41, %v265_v36  ;;  %v295_v47 = vadd.f32 1.0, %v456_v43 }
  0x2f   : > { %301 = vst.msk [vmem:[%s236_s28] sm:$0xff] %vm300_vm0, %v296_v44  ;;  %v298_v48 = vmul.f32 %v294_v45, %v266_v39 }
  0x30   : > { %302 = vst.msk [vmem:[%s236_s28 + $0x8] sm:$0xff] %vm300_vm0, %v297_v46  ;;  %v299_v49 = vmul.f32 %v295_v47, %v267_v42 }
  0x31   : > { %303 = vst.msk [vmem:[%s236_s28 + $0x10] sm:$0xff] %vm300_vm0, %v298_v48 }
  0x32   : > { %304 = vst.msk [vmem:[%s236_s28 + $0x18] sm:$0xff] %vm300_vm0, %v299_v49 }
  0x33 PF: > { %s13_s14 = sadd.s32 1, %s479_s14   ;;  %s553_s12 = smov %s475_s13 }
  0x34   : > { %p10_p5 = scmp.ge.s32.totalorder %s13_s14, 4   ;;  %s554_s13 = smov %s556_s15 }
  0x36   :  { %12 = sbr.rel (!%p10_p5) target bundleno = 2 (0x2), region = 68 }

// kernel: upsample_layer.2
= control target key start
LH: loop header
LB: loop body
LE: loop exit
PB: predicated region body
PF: predicated region fallthrough
CT: control target
= control target key end

     0   :  { %s1187_s24 = smov 0   ;;  %s1189_s25 = smov 0   ;;  %s1350_s0 = inlined_call_operand.vmem [shape: bf16[2,16,8], index: 0, kind: input, shape index: {}]   ;;  %s1351_s1 = inlined_call_operand.vmem [shape: bf16[2,1,2,8], index: 1, kind: input, shape index: {}]   ;;  %s1352_s2 = inlined_call_operand.vmem [shape: bf16[8,24], index: 2, kind: input, shape index: {}]   ;;  %s1353_s3 = inlined_call_operand.vmem [shape: f32[1,8], index: 3, kind: input, shape index: {}]   ;;  %s1354_s4 = inlined_call_operand.vmem [shape: bf16[8,24], index: 4, kind: input, shape index: {}]   ;;  %s1355_s5 = inlined_call_operand.vmem [shape: f32[1,8], index: 5, kind: input, shape index: {}]   ;;  %s1356_s6 = inlined_call_operand.vmem [shape: f32[2,2,16,8], index: 6, kind: output, shape index: {0}]   ;;  %s1357_s7 = inlined_call_operand.vmem [shape: f32[2,1,2,8], index: 7, kind: output, shape index: {1}]  }
   0x1   :  { %s1191_s26 = smov 0  }
   0x2 LB: > { %s30_s27 = sadd.s32 1, %s1135_s25  ;;  %p1018_p0 = scmp.ge.s32.totalorder %s1139_s26, 1  ;;  %s1139_s26 = sphi %s1191_s26, %s18_s26   ;;  %s1135_s25 = sphi %s1189_s25, %s1359_s25   ;;  %s1131_s24 = sphi %s1187_s24, %s1358_s24  }
   0x3   : > { %p32_p1 = scmp.ge.s32.totalorder %s30_s27, 2  ;;  %p276_p2 = scmp.lt.s32.totalorder %s1139_s26, 3 }
   0x5   : > { %s1361_s27 = smov (%p32_p1, %s30_s27), 0  ;;  %p277_p3 = pnand %p1018_p0, %p276_p2 }
   0x6   : > { %v366_v0 = vld [vmem:[%s1352_s2] sm:$0xf] (!%p277_p3)  ;;  %vm382_vm0 = vcmask (!%p277_p3), 1043456   ;;  %v1141_v1 = vmov (!%p277_p3), 0.0   ;;  %p330_p4 = scmp.lt.s32.totalorder (!%p277_p3), %s1131_s24, 1  ;;  %vm1142_vm1 = vmmov (!%p277_p3), 0   ;;  %v368_v8 = vlaneseq (!%p277_p3) }
   0x7   : > { %280 = sbr.rel (%p277_p3) target bundleno = 967 (0x3c7), region = 44  ;;  %1048 = vmatprep.subr.bf16.mxu0 (!%p277_p3), %v1141_v1  ;;  %v384_v2 = vsel (!%p277_p3), %vm382_vm0, %v366_v0, 0  ;;  %1054 = vmatprep.subr.bf16.mxu1 (!%p277_p3), %v1141_v1  ;;  %v1216_v3 = vld [vmem:[%s1353_s3] ss:$0 sm:$0xff] (!%p277_p3)  ;;  %s1143_s11 = smov (!%p277_p3), 8   ;;  %vm378_vm2 = vcmask (!%p277_p3), 64512  }
   0x8   : > { %1049 = vmatpush3.bf16.msra.mxu0 (!%p277_p3), %v384_v2  ;;  %1050 = vmatprep.mubr.msk.bf16.mxu0 (!%p277_p3), %vm1142_vm1, %v1141_v1  ;;  %v367_v4 = vld [vmem:[%s1354_s4] sm:$0xf] (!%p277_p3)  ;;  %v1248_v9 = vshrl.u32 (!%p277_p3), %v368_v8, 7  ;;  %s1144_s19 = smov (!%p277_p3), 112   ;;  %s1145_s20 = smov (!%p277_p3), 120   ;;  %vm677_vm5 = vcmask (!%p277_p3), 1040384  }
   0x9   : > { %1055 = vmatpush3.bf16.msra.mxu1 (!%p277_p3), %v384_v2  ;;  %1056 = vmatprep.mubr.msk.bf16.mxu1 (!%p277_p3), %vm1142_vm1, %v1141_v1  ;;  %v1237_v6 = vsel (!%p277_p3), %vm382_vm0, %v367_v4, 0  ;;  %s1146_s21 = smov (!%p277_p3), 16   ;;  %vm872_vm8 = vcmask (!%p277_p3), 58368  }
   0xa   : > { %494 = vrot.lane.b32.xlu0 (!%p277_p3), %v1216_v3, %s1143_s11  ;;  %1060 = vmatprep.subr.bf16.mxu0 (!%p277_p3), %v1141_v1  ;;  %v484_v12 = vsub.s32 (!%p277_p3), 1, %v1248_v9  ;;  %v1252_v15 = vadd.s32 (!%p277_p3), 8, %v1248_v9  ;;  %vm475_vm3 = vcmp.lt.s32.totalorder (!%p277_p3), %v1248_v9, 7  ;;  %vm727_vm6 = vcmp.lt.s32.totalorder (!%p277_p3), %v1248_v9, 1 }
   0xb   : > { %1066 = vmatprep.subr.bf16.mxu1 (!%p277_p3), %v1141_v1  ;;  %vm723_vm7 = vcmp.eq.s32.totalorder (!%p277_p3), %v1248_v9, 0 }
   0xc   : > { %vm472_vm4 = vcmp.eq.s32.totalorder (!%p277_p3), %v1252_v15, 15 }
   0xe   : > { %s1363_s24 = smov (!%p330_p4, %s1131_s24), 1 }
   0xf   : > { %s1035_s12 = sshll.u32 %s1363_s24, 3  ;;  %s344_s15 = scalar_lea.vmem %s1351_s1, %s1363_s24 }
  0x10   : > { %s337_s18 = scalar_lea.vmem %s1350_s0, %s1035_s12  ;;  %v427_v5 = vld [vmem:[%s344_s15] sm:$0x1]  ;;  %s1036_s28 = sshll.u32 %s1363_s24, 5 }
  0x11   : > { %v1108_v7 = vld [vmem:[%s337_s18] sm:$0xff]   ;;  %1057 = vmatmul.mubr.msk.bf16.vlgmr.msra.gmra.mrb[0].mxu1 %vm378_vm2, %v427_v5  ;;  %s353_s8 = scalar_lea.vmem %s1356_s6, %s1036_s28  ;;  %s1023_s9 = sshll.u32 %s1363_s24, 1 }
  0x12   : > { %1067 = vmatpush3.bf16.msra.mxu1 %v1237_v6  ;;  %1068 = vmatprep.mubr.msk.bf16.mxu1 %vm1142_vm1, %v1141_v1  ;;  %s361_s12 = scalar_lea.vmem %s1357_s7, %s1023_s9 }
  0x13   : > { %1051 = vmatmul.mubr.msk.bf16.vlgmr.msra.gmra.mrb[0].mxu0 %vm378_vm2, %v1108_v7 }
  0x14   : > { %1061 = vmatpush3.bf16.msra.mxu0 %v1237_v6  ;;  %1062 = vmatprep.mubr.msk.bf16.mxu0 %vm1142_vm1, %v1141_v1 }
  0x15   : > { %1072 = vmatprep.subr.bf16.mxu0 %v1141_v1 }
  0x7c   : > { %v495_v10 = vpop.permute.xlu0 %494 }
  0xe4   : > { %v465_v11 = vpop.f32.mrb[0].mxu1 }
  0xe5   : > { %v1058_v13 = vpop.f32.mrb[1].mxu1  ;;  %v485_v21 = vrot.slane %v465_v11, %v484_v12 }
  0xe6   : > { %v420_v14 = vpop.f32.mrb[0].mxu0  ;;  %v468_v16 = vpop.f32.mrb[2].mxu1 }
  0xe7   : > { %v497_v17 = vadd.f32 %v495_v10, %v420_v14  ;;  %519 = vrot.lane.b32.xlu1 %v420_v14, %s1144_s19  ;;  %v1052_v18 = vpop.f32.mrb[1].mxu0  ;;  %v1059_v19 = vpop.f32.mrb[3].mxu1  ;;  %v473_v22 = vrot.slane %v420_v14, 1 }
  0xe8   : > { %v423_v20 = vpop.f32.mrb[2].mxu0 }
  0xe9   : > { %v501_v23 = vmul.f32 0.044715, %v497_v17  ;;  %v474_v24 = vrot.slane %v423_v20, 1  ;;  %v498_v25 = vadd.f32 %v495_v10, %v423_v20  ;;  %v1053_v26 = vpop.f32.mrb[3].mxu0  ;;  %v499_v42 = vmul.f32 0.5, %v497_v17 }
  0xeb   : > { %v502_v27 = vmul.f32 0.044715, %v498_v25  ;;  %521 = vrot.lane.b32.xlu1 %v423_v20, %s1144_s19  ;;  %v503_v28 = vmul.f32 %v501_v23, %v497_v17  ;;  %v476_v29 = vsel %vm475_vm3, %v473_v22, %v474_v24  ;;  %v477_v30 = vsel %vm475_vm3, %v474_v24, %v473_v22 }
  0xec   : > { %v487_v33 = vsel %vm472_vm4, %v485_v21, %v477_v30  ;;  %v500_v43 = vmul.f32 0.5, %v498_v25  ;;  %v736_v22 = vsub.s32 0, %v1248_v9 }
  0xed   : > { %v504_v31 = vmul.f32 %v502_v27, %v498_v25  ;;  %v505_v32 = vmul.f32 %v503_v28, %v497_v17 }
  0xef   : > { %v506_v34 = vmul.f32 %v504_v31, %v498_v25  ;;  %v507_v35 = vadd.f32 %v505_v32, %v497_v17 }
  0xf1   : > { %v508_v36 = vadd.f32 %v506_v34, %v498_v25  ;;  %v509_v37 = vmul.f32 0.7978846, %v507_v35 }
  0xf3   : > { %v510_v38 = vmul.f32 0.7978846, %v508_v36  ;;  %1109 = vtanh.f32 %v509_v37 }
  0xf5   : > { %1111 = vtanh.f32 %v510_v38 }
  0xfd   : > { %v1110_v39 = vpop.eup %1109 }
  0xfe   : > { %v513_v40 = vadd.f32 1.0, %v1110_v39 }
  0xff   : > { %v1112_v41 = vpop.eup %1111 }
 0x100   : > { %v514_v44 = vadd.f32 1.0, %v1112_v41  ;;  %v1266_v45 = vmul.f32 %v513_v40, %v499_v42 }
 0x102   : > { %v1268_v46 = vmul.f32 %v514_v44, %v500_v43 }
 0x104   : > { %v577_v47 = vpack.c.bf16 %v1268_v46, %v1266_v45 }
 0x106   : > { %579 = vrot.lane.b32.xlu0 %v577_v47, %s1145_s20 }
 0x10a   : > { %674 = vrot.lane.b32.xlu0 %v1141_v1, %s1145_s20 }
 0x159   : > { %v520_v48 = vpop.permute.xlu1 %519 }
 0x15a   : > { %v525_v49 = vadd.f32 %v520_v48, %v476_v29 }
 0x15c   : > { %v527_v50 = vadd.f32 %v1216_v3, %v525_v49 }
 0x15d   : > { %v522_v51 = vpop.permute.xlu1 %521 }
 0x15e   : > { %v531_v52 = vmul.f32 0.044715, %v527_v50  ;;  %v526_v53 = vadd.f32 %v522_v51, %v487_v33  ;;  %v529_v5 = vmul.f32 0.5, %v527_v50 }
 0x160   : > { %v533_v54 = vmul.f32 %v531_v52, %v527_v50  ;;  %v528_v55 = vadd.f32 %v1216_v3, %v526_v53 }
 0x162   : > { %v535_v56 = vmul.f32 %v533_v54, %v527_v50  ;;  %v532_v57 = vmul.f32 0.044715, %v528_v55  ;;  %v530_v7 = vmul.f32 0.5, %v528_v55 }
 0x164   : > { %v537_v58 = vadd.f32 %v535_v56, %v527_v50  ;;  %v534_v59 = vmul.f32 %v532_v57, %v528_v55 }
 0x166   : > { %v539_v60 = vmul.f32 0.7978846, %v537_v58  ;;  %v536_v61 = vmul.f32 %v534_v59, %v528_v55 }
 0x168   : > { %1113 = vtanh.f32 %v539_v60  ;;  %v538_v62 = vadd.f32 %v536_v61, %v528_v55 }
 0x16a   : > { %v540_v63 = vmul.f32 0.7978846, %v538_v62 }
 0x16c   : > { %1115 = vtanh.f32 %v540_v63 }
 0x172   : > { %v1114_v0 = vpop.eup %1113 }
 0x173   : > { %v543_v2 = vadd.f32 1.0, %v1114_v0 }
 0x175   : > { %v1278_v3 = vmul.f32 %v543_v2, %v529_v5 }
 0x176   : > { %v1116_v4 = vpop.eup %1115 }
 0x177   : > { %v544_v8 = vadd.f32 1.0, %v1116_v4 }
 0x178   : > { %v580_v10 = vpop.permute.xlu0 %579 }
 0x179   : > { %1063 = vmatmul.mubr.msk.bf16.vlgmr.msra.gmra.mrb[4].mxu0 %vm378_vm2, %v580_v10  ;;  %v1280_v11 = vmul.f32 %v544_v8, %v530_v7 }
 0x17a   : > { %1073 = vmatpush3.bf16.msra.mxu0 %v1237_v6  ;;  %1074 = vmatprep.mubr.msk.bf16.mxu0 %vm1142_vm1, %v1141_v1 }
 0x17b   : > { %v628_v13 = vpack.c.bf16 %v1280_v11, %v1278_v3 }
 0x17c   : > { %v675_v14 = vpop.permute.xlu0 %674 }
 0x17d   : > { %v678_v16 = vsel %vm677_vm5, 0.0, %v675_v14  ;;  %1069 = vmatmul.mubr.msk.bf16.vlgmr.msra.gmra.mrb[4].mxu1 %vm378_vm2, %v628_v13 }
 0x17e   : > { %v679_v17 = vpack.c.bf16 %v678_v16, %v678_v16 }
 0x181   : > { %1075 = vmatmul.mubr.msk.bf16.vlgmr.msra.gmra.mrb[8].mxu0 %vm378_vm2, %v679_v17 }
 0x24c   : > { %v621_v18 = vpop.f32.mrb[4].mxu0 }
 0x24d   : > { %742 = vrot.lane.b32.xlu1 %v621_v18, %s1144_s19  ;;  %v1064_v19 = vpop.f32.mrb[5].mxu0 }
 0x24e   : > { %v624_v20 = vpop.f32.mrb[6].mxu0 }
 0x24f   : > { %744 = vrot.lane.b32.xlu0 %v624_v20, %s1144_s19  ;;  %v1065_v6 = vpop.f32.mrb[7].mxu0 }
 0x250   : > { %v666_v1 = vpop.f32.mrb[4].mxu1 }
 0x251   : > { %v1070_v21 = vpop.f32.mrb[5].mxu1  ;;  %v725_v24 = vrot.slane %v666_v1, 7 }
 0x252   : > { %v669_v23 = vpop.f32.mrb[6].mxu1 }
 0x253   : > { %v726_v25 = vrot.slane %v669_v23, 7  ;;  %v1071_v26 = vpop.f32.mrb[7].mxu1 }
 0x254   : > { %v717_v27 = vpop.f32.mrb[8].mxu0 }
 0x255   : > { %v737_v28 = vrot.slane %v717_v27, %v736_v22  ;;  %v1076_v29 = vpop.f32.mrb[9].mxu0  ;;  %v729_v30 = vsel %vm727_vm6, %v726_v25, %v725_v24  ;;  %v728_v31 = vsel %vm727_vm6, %v725_v24, %v726_v25  ;;  %v755_v41 = vrot.slane %v717_v27, %v484_v12 }
 0x256   : > { %v720_v32 = vpop.f32.mrb[10].mxu0 }
 0x257   : > { %v1077_v33 = vpop.f32.mrb[11].mxu0  ;;  %v738_v34 = vsel %vm723_vm7, %v737_v28, %v729_v30 }
 0x2bf   : > { %v743_v35 = vpop.permute.xlu1 %742 }
 0x2c0   : > { %v748_v37 = vrot.slane %v743_v35, 1 }
 0x2c1   : > { %v745_v36 = vpop.permute.xlu0 %744 }
 0x2c2   : > { %v749_v38 = vrot.slane %v745_v36, 1 }
 0x2c4   : > { %v751_v39 = vsel %vm475_vm3, %v749_v38, %v748_v37  ;;  %v750_v40 = vsel %vm475_vm3, %v748_v37, %v749_v38 }
 0x2c5   : > { %760 = vrot.lane.b32.xlu1 %v751_v39, %s1146_s21  ;;  %758 = vrot.lane.b32.xlu0 %v750_v40, %s1146_s21 }
 0x2c9   : > { %766 = vrot.lane.b32.xlu1 %v621_v18, %s1145_s20  ;;  %768 = vrot.lane.b32.xlu0 %v624_v20, %s1145_s20 }
 0x2cd   : > { %802 = vrot.lane.b32.xlu1 %v666_v1, %s1145_s20  ;;  %804 = vrot.lane.b32.xlu0 %v669_v23, %s1145_s20 }
 0x2d1   : > { %776 = vrot.lane.b32.xlu1 %v666_v1, %s1144_s19  ;;  %778 = vrot.lane.b32.xlu0 %v669_v23, %s1144_s19 }
 0x337   : > { %v761_v42 = vpop.permute.xlu1 %760  ;;  %v759_v43 = vpop.permute.xlu0 %758 }
 0x338   : > { %812 = vrot.lane.b32.xlu1 %v759_v43, %s1144_s19  ;;  %v765_v44 = vsel %vm472_vm4, %v755_v41, %v761_v42 }
 0x339   : > { %814 = vrot.lane.b32.xlu0 %v765_v44, %s1144_s19 }
 0x33b   : > { %v767_v47 = vpop.permute.xlu1 %766  ;;  %v769_v48 = vpop.permute.xlu0 %768 }
 0x33c   : > { %794 = vrot.lane.b32.xlu1 %v1266_v45, %s1145_s20  ;;  %v772_v50 = vadd.f32 %v767_v47, %v738_v34  ;;  %v773_v52 = vadd.f32 %v769_v48, %v728_v31  ;;  %v1030_v45 = vld [vmem:[%s1355_s5] ss:$0 sm:$0xff] }
 0x33d   : > { %796 = vrot.lane.b32.xlu0 %v1268_v46, %s1145_s20 }
 0x33f   : > { %v803_v9 = vpop.permute.xlu1 %802  ;;  %v805_v12 = vpop.permute.xlu0 %804 }
 0x340   : > { %v808_v53 = vadd.f32 %v803_v9, %v621_v18  ;;  %v809_v54 = vadd.f32 %v805_v12, %v624_v20 }
 0x343   : > { %v777_v49 = vpop.permute.xlu1 %776  ;;  %v779_v51 = vpop.permute.xlu0 %778 }
 0x344   : > { %v782_v15 = vadd.f32 %v777_v49, %v772_v50  ;;  %v783_v55 = vadd.f32 %v779_v51, %v773_v52 }
 0x346   : > { %v790_v60 = vadd.f32 %v1030_v45, %v782_v15  ;;  %v791_v63 = vadd.f32 %v1030_v45, %v783_v55 }
 0x3aa   : > { %v813_v56 = vpop.permute.xlu1 %812 }
 0x3ab   : > { %v818_v57 = vadd.f32 %v813_v56, %v808_v53  ;;  %v815_v46 = vpop.permute.xlu0 %814 }
 0x3ac   : > { %v819_v58 = vadd.f32 %v815_v46, %v809_v54 }
 0x3ad   : > { %v820_v59 = vadd.f32 %v1030_v45, %v818_v57 }
 0x3ae   : > { %v821_v61 = vadd.f32 %v1030_v45, %v819_v58  ;;  %v795_v62 = vpop.permute.xlu1 %794 }
 0x3af   : > { %v822_v0 = vadd.f32 %v820_v59, %v1278_v3  ;;  %v800_v2 = vadd.f32 %v795_v62, %v790_v60  ;;  %v797_v4 = vpop.permute.xlu0 %796 }
 0x3b0   : > { %v823_v5 = vadd.f32 %v821_v61, %v1280_v11  ;;  %v801_v7 = vadd.f32 %v797_v4, %v791_v63 }
 0x3b1   : > { %1031 = vst.msk [vmem:[%s353_s8 + $0x10] sm:$0xff] %vm378_vm2, %v822_v0  ;;  %v838_v8 = vsel %vm378_vm2, %v822_v0, 0.0  ;;  %v859_v10 = vmul.f32 %v822_v0, %v822_v0  ;;  %824 = vst.msk [vmem:[%s353_s8] sm:$0xff] %vm378_vm2, %v800_v2  ;;  %v829_v13 = vsel %vm378_vm2, %v800_v2, 0.0  ;;  %v848_v14 = vmul.f32 %v800_v2, %v800_v2 }
 0x3b2   : > { %1032 = vst.msk [vmem:[%s353_s8 + $0x18] sm:$0xff] %vm378_vm2, %v823_v5  ;;  %v839_v16 = vsel %vm378_vm2, %v823_v5, 0.0  ;;  %v860_v3 = vmul.f32 %v823_v5, %v823_v5  ;;  %825 = vst.msk [vmem:[%s353_s8 + $0x8] sm:$0xff] %vm378_vm2, %v801_v7  ;;  %v830_v11 = vsel %vm378_vm2, %v801_v7, 0.0  ;;  %v849_v17 = vmul.f32 %v801_v7, %v801_v7 }
 0x3b3   : > { %v861_v18 = vsel %vm378_vm2, %v859_v10, 0.0  ;;  %v840_v19 = vadd.f32 %v839_v16, %v838_v8  ;;  %v850_v20 = vsel %vm378_vm2, %v848_v14, 0.0  ;;  %v831_v6 = vadd.f32 %v830_v11, %v829_v13 }
 0x3b4   : > { %v862_v1 = vsel %vm378_vm2, %v860_v3, 0.0  ;;  %v851_v21 = vsel %vm378_vm2, %v849_v17, 0.0 }
 0x3b5   : > { %v841_v22 = vrot.slane %v840_v19, 4  ;;  %v863_v23 = vadd.f32 %v862_v1, %v861_v18  ;;  %v832_v24 = vrot.slane %v831_v6, 4  ;;  %v852_v25 = vadd.f32 %v851_v21, %v850_v20 }
 0x3b7   : > { %v842_v26 = vadd.f32 %v841_v22, %v840_v19  ;;  %v864_v27 = vrot.slane %v863_v23, 4  ;;  %v833_v28 = vadd.f32 %v832_v24, %v831_v6  ;;  %v853_v29 = vrot.slane %v852_v25, 4 }
 0x3b9   : > { %v843_v30 = vrot.slane %v842_v26, 2  ;;  %v865_v31 = vadd.f32 %v864_v27, %v863_v23  ;;  %v834_v32 = vrot.slane %v833_v28, 2  ;;  %v854_v33 = vadd.f32 %v853_v29, %v852_v25 }
 0x3bb   : > { %v844_v34 = vadd.f32 %v843_v30, %v842_v26  ;;  %v866_v35 = vrot.slane %v865_v31, 2  ;;  %v835_v36 = vadd.f32 %v834_v32, %v833_v28  ;;  %v855_v37 = vrot.slane %v854_v33, 2 }
 0x3bd   : > { %v845_v38 = vrot.slane %v844_v34, 1  ;;  %v867_v39 = vadd.f32 %v866_v35, %v865_v31  ;;  %v836_v40 = vrot.slane %v835_v36, 1  ;;  %v856_v41 = vadd.f32 %v855_v37, %v854_v33 }
 0x3bf   : > { %v868_v42 = vrot.slane %v867_v39, 1  ;;  %v846_v43 = vadd.f32 %v845_v38, %v844_v34  ;;  %v837_v44 = vadd.f32 %v836_v40, %v835_v36  ;;  %v857_v47 = vrot.slane %v856_v41, 1 }
 0x3c1   : > { %v869_v48 = vadd.f32 %v868_v42, %v867_v39  ;;  %v847_v9 = vadd.f32 %v846_v43, %v837_v44  ;;  %v858_v12 = vadd.f32 %v857_v47, %v856_v41 }
 0x3c3   : > { %v870_v49 = vadd.f32 %v869_v48, %v858_v12 }
 0x3c5   : > { %v871_v50 = vsel %vm677_vm5, %v847_v9, %v870_v49 }
 0x3c6   : > { %873 = vst.msk [vmem:[%s361_s12] sm:$0x3] %vm872_vm8, %v871_v50 }
 0x3c7 PF: > { %s18_s26 = sadd.s32 1, %s1139_s26   ;;  %s1358_s24 = smov %s1135_s25 }
 0x3c8   : > { %p15_p5 = scmp.ge.s32.totalorder %s18_s26, 4   ;;  %s1359_s25 = smov %s1361_s27 }
 0x3ca   :  { %17 = sbr.rel (!%p15_p5) target bundleno = 2 (0x2), region = 90 }

</bundles_post_ra>
